<compile_context>
chip_gen: v7x
topology: tpu7x:2x2x1
jax: 0.10.0
libtpu: 0.0.40
codegen_flags: <defaults>
</compile_context>

<pallas_src>
import functools
import math

import numpy as np
import jax
import jax.numpy as jnp
from jax.experimental import pallas as pl
from jax.experimental.pallas import tpu as pltpu


# ----------------------------------------------------------------------------
# small helpers
# ----------------------------------------------------------------------------
def _round_up(x, m):
    return ((x + m - 1) // m) * m


def _sigmoid(x):
    return 1.0 / (1.0 + jnp.exp(-x))


# ----------------------------------------------------------------------------
# Tiled matmul kernel (bf16 MXU operands, f32 accumulation, fused bias/act,
# optional fused elementwise add on the LHS).
# ----------------------------------------------------------------------------
def _matmul_kernel(*refs, act, nk, fused_add):
    if fused_add:
        x_ref, x2_ref, w_ref, b_ref, o_ref, acc_ref = refs
        x = x_ref[...] + x2_ref[...]
    else:
        x_ref, w_ref, b_ref, o_ref, acc_ref = refs
        x = x_ref[...]

    @pl.when(pl.program_id(2) == 0)
    def _():
        acc_ref[...] = jnp.zeros_like(acc_ref)

    acc_ref[...] += jnp.dot(x, w_ref[...], preferred_element_type=jnp.float32)

    @pl.when(pl.program_id(2) == nk - 1)
    def _():
        y = acc_ref[...] + b_ref[...]
        if act == "relu":
            y = jnp.maximum(y, 0.0)
        o_ref[...] = y.astype(o_ref.dtype)


def matmul(x, w, b=None, act="none", x_add=None, bm=256, bn=256, bk=256):
    """y = act((x [+ x_add]) @ w + b); x:(M,K), w:(K,N), b:(N,)."""
    M, K = x.shape
    N = w.shape[1]
    if b is None:
        b = jnp.zeros((N,), jnp.float32)

    tm = min(bm, _round_up(M, 8))
    tn = min(bn, _round_up(N, 128))        # lane-dense output tiles
    k8 = _round_up(K, 8)
    tk = k8 if k8 <= bk else bk
    Mp, Np, Kp = _round_up(M, tm), _round_up(N, tn), _round_up(K, tk)
    nk = Kp // tk

    xb = jnp.pad(x, ((0, Mp - M), (0, Kp - K))).astype(jnp.bfloat16)
    wb = jnp.pad(w, ((0, Kp - K), (0, Np - N))).astype(jnp.bfloat16)
    bb = jnp.pad(b.astype(jnp.float32), (0, Np - N)).reshape(1, Np)

    args = [xb]
    in_specs = [pl.BlockSpec((tm, tk), lambda i, j, k: (i, k))]
    if x_add is not None:
        xa = jnp.pad(x_add, ((0, Mp - M), (0, Kp - K))).astype(jnp.bfloat16)
        args.append(xa)
        in_specs.append(pl.BlockSpec((tm, tk), lambda i, j, k: (i, k)))
    args += [wb, bb]
    in_specs += [pl.BlockSpec((tk, tn), lambda i, j, k: (k, j)),
                 pl.BlockSpec((1, tn), lambda i, j, k: (0, j))]

    out = pl.pallas_call(
        functools.partial(_matmul_kernel, act=act, nk=nk,
                          fused_add=x_add is not None),
        grid=(Mp // tm, Np // tn, nk),
        out_shape=jax.ShapeDtypeStruct((Mp, Np), jnp.float32),
        in_specs=in_specs,
        out_specs=pl.BlockSpec((tm, tn), lambda i, j, k: (i, j)),
        scratch_shapes=[pltpu.VMEM((tm, tn), jnp.float32)],
        compiler_params=pltpu.CompilerParams(
            dimension_semantics=("parallel", "parallel", "arbitrary")),
    )(*args)
    return out[:M, :N]


# ----------------------------------------------------------------------------
# Fused encoder-layer tail:
#   gated RMSNorm -> out_proj -> +residual -> LN1 -> FFN -> +residual -> LN2
# gridded over token tiles (one pallas_call per layer instead of ~8).
# ----------------------------------------------------------------------------
def _layer_tail_kernel(y_ref, z_ref, src_ref, nw_ref, wo_ref,
                       ln1w_ref, ln1b_ref, w1_ref, b1_ref, w2_ref, b2_ref,
                       ln2w_ref, ln2b_ref, o_ref, *, eps):
    z = z_ref[...]
    y = y_ref[...] * (z * _sigmoid(z))                       # gate (norm after gate)
    y = y * jax.lax.rsqrt(jnp.mean(y * y, axis=-1, keepdims=True) + eps)
    y = y * nw_ref[...]
    src2 = jnp.dot(y.astype(jnp.bfloat16), wo_ref[...],
                   preferred_element_type=jnp.float32)       # out_proj
    h = src_ref[...] + src2                                   # residual 1
    mu = jnp.mean(h, axis=-1, keepdims=True)
    hc = h - mu
    h = hc * jax.lax.rsqrt(jnp.mean(hc * hc, axis=-1, keepdims=True) + eps)
    h = h * ln1w_ref[...] + ln1b_ref[...]                     # LN1
    f = jnp.dot(h.astype(jnp.bfloat16), w1_ref[...],
                preferred_element_type=jnp.float32) + b1_ref[...]
    f = jnp.maximum(f, 0.0)                                   # relu
    f = jnp.dot(f.astype(jnp.bfloat16), w2_ref[...],
                preferred_element_type=jnp.float32) + b2_ref[...]
    g = h + f                                                 # residual 2
    mu2 = jnp.mean(g, axis=-1, keepdims=True)
    gc = g - mu2
    g = gc * jax.lax.rsqrt(jnp.mean(gc * gc, axis=-1, keepdims=True) + eps)
    o_ref[...] = g * ln2w_ref[...] + ln2b_ref[...]            # LN2


def layer_tail(y, z, src, lp, eps=1e-5, bm=256):
    M, d_inner = y.shape
    D = src.shape[1]
    Fdim = lp["lin1_w"].shape[1]
    tm = min(bm, _round_up(M, 8))
    Mp = _round_up(M, tm)
    pad = Mp - M
    yp = jnp.pad(y, ((0, pad), (0, 0)))
    zp = jnp.pad(z, ((0, pad), (0, 0)))
    sp = jnp.pad(src, ((0, pad), (0, 0)))
    row = lambda v: v.reshape(1, -1)

    out = pl.pallas_call(
        functools.partial(_layer_tail_kernel, eps=eps),
        grid=(Mp // tm,),
        out_shape=jax.ShapeDtypeStruct((Mp, D), jnp.float32),
        in_specs=[
            pl.BlockSpec((tm, d_inner), lambda i: (i, 0)),
            pl.BlockSpec((tm, d_inner), lambda i: (i, 0)),
            pl.BlockSpec((tm, D), lambda i: (i, 0)),
            pl.BlockSpec((1, d_inner), lambda i: (0, 0)),
            pl.BlockSpec((d_inner, D), lambda i: (0, 0)),
            pl.BlockSpec((1, D), lambda i: (0, 0)),
            pl.BlockSpec((1, D), lambda i: (0, 0)),
            pl.BlockSpec((D, Fdim), lambda i: (0, 0)),
            pl.BlockSpec((1, Fdim), lambda i: (0, 0)),
            pl.BlockSpec((Fdim, D), lambda i: (0, 0)),
            pl.BlockSpec((1, D), lambda i: (0, 0)),
            pl.BlockSpec((1, D), lambda i: (0, 0)),
            pl.BlockSpec((1, D), lambda i: (0, 0)),
        ],
        out_specs=pl.BlockSpec((tm, D), lambda i: (i, 0)),
        compiler_params=pltpu.CompilerParams(dimension_semantics=("parallel",)),
    )(yp, zp, sp,
      row(lp["mamba"]["norm_w"]),
      lp["mamba"]["out_proj_w"].astype(jnp.bfloat16),
      row(lp["norm1_w"]), row(lp["norm1_b"]),
      lp["lin1_w"].astype(jnp.bfloat16), row(lp["lin1_b"]),
      lp["lin2_w"].astype(jnp.bfloat16), row(lp["lin2_b"]),
      row(lp["norm2_w"]), row(lp["norm2_b"]))
    return out[:M]


# ----------------------------------------------------------------------------
# Depthwise causal conv1d + SiLU (per-batch grid, aligned shifted slices).
# ----------------------------------------------------------------------------
def _causal_conv_silu_kernel(x_ref, w_ref, b_ref, o_ref, *, L, K):
    x0 = x_ref[...]
    acc = b_ref[...] + x0[K - 1:K - 1 + L, :] * w_ref[K - 1:K, :]
    for k in range(K - 1):
        acc = acc + x0[k:k + L, :] * w_ref[k:k + 1, :]
    o_ref[...] = acc * _sigmoid(acc)


def causal_conv1d_silu(x, w, b):
    """PyTorch Conv1d(groups=C, padding=K-1)[..., :L] + SiLU.  x:(B,L,C)."""
    Bb, L, C = x.shape
    K = w.shape[0]
    Lout = _round_up(L, 8)
    Lin = Lout + K - 1
    xp = jnp.pad(x, ((0, 0), (K - 1, Lin - (L + K - 1)), (0, 0)))
    out = pl.pallas_call(
        functools.partial(_causal_conv_silu_kernel, L=Lout, K=K),
        grid=(Bb,),
        out_shape=jax.ShapeDtypeStruct((Bb, Lout, C), jnp.float32),
        in_specs=[pl.BlockSpec((None, Lin, C), lambda bb: (bb, 0, 0)),
                  pl.BlockSpec((K, C), lambda bb: (0, 0)),
                  pl.BlockSpec((1, C), lambda bb: (0, 0))],
        out_specs=pl.BlockSpec((None, Lout, C), lambda bb: (bb, 0, 0)),
        compiler_params=pltpu.CompilerParams(dimension_semantics=("parallel",)),
    )(xp, w, b.reshape(1, C))
    return out[:, :L, :]


# ----------------------------------------------------------------------------
# Mamba2 SSD — chunked scan, heads folded into lanes, VMEM state carry.
# ----------------------------------------------------------------------------
def _ssd_kernel(x_ref, dt_ref, b_ref, c_ref, A_ref, D_ref, db_ref,
                o_ref, state_ref, *, Q, H, P, L_valid):
    cidx = pl.program_id(1)

    @pl.when(cidx == 0)
    def _():
        state_ref[...] = jnp.zeros_like(state_ref)

    x = x_ref[...]                               # (Q, H*P)
    Bm = b_ref[...]                              # (Q, N)
    Cm = c_ref[...]                              # (Q, N)
    Arow = A_ref[...]                            # (1, H)
    Drow = D_ref[...]                            # (1, H)

    v = dt_ref[...] + db_ref[...]                # (Q, H)
    dt = jnp.maximum(v, 0.0) + jnp.log(1.0 + jnp.exp(-jnp.abs(v)))  # softplus
    pos = cidx * Q + jax.lax.broadcasted_iota(jnp.int32, (Q, 1), 0)
    dt = jnp.where(pos < L_valid, dt, 0.0)       # mask padded rows
    a = dt * Arow                                # (Q, H), a <= 0

    rows = jax.lax.broadcasted_iota(jnp.int32, (Q, Q), 0)
    cols = jax.lax.broadcasted_iota(jnp.int32, (Q, Q), 1)
    tril = rows >= cols
    tri_f = tril.astype(jnp.float32)

    # inclusive within-chunk cumulative sums of a (shared iotas/masks, all heads)
    cum_col = jnp.dot(tri_f, a, preferred_element_type=jnp.float32)       # (Q, H)
    cum_row = jax.lax.dot_general(a, tri_f, (((0,), (1,)), ((), ())),
                                  preferred_element_type=jnp.float32)     # (H, Q)

    CB = jax.lax.dot_general(Cm, Bm, (((1,), (1,)), ((), ())),
                             preferred_element_type=jnp.float32)          # (Q, Q)

    st = state_ref[...]                          # previous inter-chunk state (N, H*P)
    y_parts, s_parts = [], []
    for h in range(H):                           # static unroll over heads
        ci = cum_col[:, h:h + 1]                 # (Q, 1)
        cj = cum_row[h:h + 1, :]                 # (1, Q)
        decay = jnp.exp(jnp.where(tril, ci - cj, 0.0)) * tri_f
        xh = x[:, h * P:(h + 1) * P]             # (Q, P)
        xdt = xh * dt[:, h:h + 1]
        sh = st[:, h * P:(h + 1) * P]            # (N, P)
        y = jnp.dot(CB * decay, xdt, preferred_element_type=jnp.float32)   # intra
        y = y + jnp.exp(ci) * jnp.dot(Cm, sh, preferred_element_type=jnp.float32)
        y = y + Drow[:, h:h + 1] * xh
        y_parts.append(y)
        # state update for next chunk
        tot = cum_row[h:h + 1, Q - 1:Q]          # (1, 1)
        upd = jax.lax.dot_general(Bm, xdt * jnp.exp(tot - ci),
                                  (((0,), (0,)), ((), ())),
                                  preferred_element_type=jnp.float32)      # (N, P)
        s_parts.append(jnp.exp(tot) * sh + upd)

    o_ref[...] = jnp.concatenate(y_parts, axis=1) if H > 1 else y_parts[0]
    state_ref[...] = jnp.concatenate(s_parts, axis=1) if H > 1 else s_parts[0]


def ssd(x_flat, dt_blh, Bm, Cm, A, D, dt_bias, nheads, headdim, chunk=64):
    """Chunked Mamba2 SSD. x:(B,L,H*P), dt:(B,L,H) raw, Bm/Cm:(B,L,N)."""
    Bb, L, HP = x_flat.shape
    N = Bm.shape[-1]
    Q = min(chunk, _round_up(L, 8))
    Lp = _round_up(L, Q)
    pad = Lp - L
    if pad:
        x_flat = jnp.pad(x_flat, ((0, 0), (0, pad), (0, 0)))
        dt_blh = jnp.pad(dt_blh, ((0, 0), (0, pad), (0, 0)))
        Bm = jnp.pad(Bm, ((0, 0), (0, pad), (0, 0)))
        Cm = jnp.pad(Cm, ((0, 0), (0, pad), (0, 0)))
    nchunks = Lp // Q
    H = nheads
    y = pl.pallas_call(
        functools.partial(_ssd_kernel, Q=Q, H=H, P=headdim, L_valid=L),
        grid=(Bb, nchunks),
        out_shape=jax.ShapeDtypeStruct((Bb, Lp, HP), jnp.float32),
        in_specs=[
            pl.BlockSpec((None, Q, HP), lambda b, c: (b, c, 0)),
            pl.BlockSpec((None, Q, H), lambda b, c: (b, c, 0)),
            pl.BlockSpec((None, Q, N), lambda b, c: (b, c, 0)),
            pl.BlockSpec((None, Q, N), lambda b, c: (b, c, 0)),
            pl.BlockSpec((1, H), lambda b, c: (0, 0)),
            pl.BlockSpec((1, H), lambda b, c: (0, 0)),
            pl.BlockSpec((1, H), lambda b, c: (0, 0)),
        ],
        out_specs=pl.BlockSpec((None, Q, HP), lambda b, c: (b, c, 0)),
        scratch_shapes=[pltpu.VMEM((N, HP), jnp.float32)],
        compiler_params=pltpu.CompilerParams(
            dimension_semantics=("parallel", "arbitrary")),
    )(x_flat, dt_blh, Bm, Cm,
      A.reshape(1, H), D.reshape(1, H), dt_bias.reshape(1, H))
    return y[:, :L, :]


# ----------------------------------------------------------------------------
# FPN kernels
# ----------------------------------------------------------------------------
def _resize_matrix(n_in, n_out):
    """Row-interp matrix matching F.interpolate(bilinear, align_corners=False)."""
    R = np.zeros((n_out, n_in), np.float32)
    scale = n_in / n_out
    for i in range(n_out):
        s = max((i + 0.5) * scale - 0.5, 0.0)
        i0 = min(int(np.floor(s)), n_in - 1)
        i1 = min(i0 + 1, n_in - 1)
        f = s - i0
        R[i, i0] += 1.0 - f
        R[i, i1] += f
    return jnp.asarray(R)


def _upsample_kernel(top_ref, rwT_ref, rh_ref, o_ref, *, C, hin):
    t = jnp.dot(top_ref[...], rwT_ref[...], preferred_element_type=jnp.float32)
    Hout = rh_ref.shape[0]
    for c in range(C):                                     # static unroll
        tc = t[c * hin:(c + 1) * hin, :]
        o_ref[c * Hout:(c + 1) * Hout, :] = jnp.dot(
            rh_ref[...], tc, preferred_element_type=jnp.float32)


def bilinear_upsample(top_nchw, Hout, Wout):
    Bb, C, hin, win = top_nchw.shape
    Rh = _resize_matrix(hin, Hout)           # (Hout, hin)
    RwT = _resize_matrix(win, Wout).T        # (win, Wout)
    tin = top_nchw.reshape(Bb, C * hin, win)
    out = pl.pallas_call(
        functools.partial(_upsample_kernel, C=C, hin=hin),
        grid=(Bb,),
        out_shape=jax.ShapeDtypeStruct((Bb, C * Hout, Wout), jnp.float32),
        in_specs=[pl.BlockSpec((None, C * hin, win), lambda b: (b, 0, 0)),
                  pl.BlockSpec((win, Wout), lambda b: (0, 0)),
                  pl.BlockSpec((Hout, hin), lambda b: (0, 0))],
        out_specs=pl.BlockSpec((None, C * Hout, Wout), lambda b: (b, 0, 0)),
        compiler_params=pltpu.CompilerParams(dimension_semantics=("parallel",)),
    )(tin, RwT, Rh)
    return out.reshape(Bb, C, Hout, Wout)


def _fpn_merge_kernel(x_ref, up_ref, mask_ref, wlat_ref, blat_ref,
                      wconv_ref, bconv_ref, o_ref, *, H, W):
    Wp = W + 2
    P2 = (H + 2) * Wp
    ext = Wp + 1
    lat = jnp.dot(x_ref[...], wlat_ref[...], preferred_element_type=jnp.float32)
    s = (lat + blat_ref[...] + up_ref[...]) * mask_ref[...]     # zero outside interior
    acc = None
    for dy in range(3):
        for dx in range(3):
            start = ext + (dy - 1) * Wp + (dx - 1)
            sv = s[start:start + P2, :]
            term = jnp.dot(sv, wconv_ref[dy, dx],
                           preferred_element_type=jnp.float32)
            acc = term if acc is None else acc + term
    o_ref[...] = jnp.maximum(acc + bconv_ref[...], 0.0)


def fpn_merge(x_nchw, up_nchw, wlat, blat, wconv, bconv):
    """relu(conv3x3(lateral1x1(x) + up) + b), fused; NCHW in / NCHW out."""
    Bb, Cin, H, W = x_nchw.shape
    Cm = up_nchw.shape[1]
    Cout = wconv.shape[-1]
    Wp = W + 2
    P2 = (H + 2) * Wp
    ext = Wp + 1
    P3 = P2 + 2 * ext

    def prep(t):  # NCHW -> zero-padded, flattened NHWC tokens (B, P3, C)
        t = jnp.transpose(t, (0, 2, 3, 1))
        t = jnp.pad(t, ((0, 0), (1, 1), (1, 1), (0, 0)))
        t = t.reshape(Bb, P2, -1)
        return jnp.pad(t, ((0, 0), (ext, ext), (0, 0)))

    xt = prep(x_nchw)
    ut = prep(up_nchw)
    mask_np = np.zeros((P3, 1), np.float32)
    for ii in range(1, H + 1):
        for jj in range(1, W + 1):
            mask_np[ext + ii * Wp + jj, 0] = 1.0
    mask = jnp.asarray(mask_np)

    out = pl.pallas_call(
        functools.partial(_fpn_merge_kernel, H=H, W=W),
        grid=(Bb,),
        out_shape=jax.ShapeDtypeStruct((Bb, P2, Cout), jnp.float32),
        in_specs=[
            pl.BlockSpec((None, P3, Cin), lambda b: (b, 0, 0)),
            pl.BlockSpec((None, P3, Cm), lambda b: (b, 0, 0)),
            pl.BlockSpec((P3, 1), lambda b: (0, 0)),
            pl.BlockSpec((Cin, Cm), lambda b: (0, 0)),
            pl.BlockSpec((1, Cm), lambda b: (0, 0)),
            pl.BlockSpec((3, 3, Cm, Cout), lambda b: (0, 0, 0, 0)),
            pl.BlockSpec((1, Cout), lambda b: (0, 0)),
        ],
        out_specs=pl.BlockSpec((None, P2, Cout), lambda b: (b, 0, 0)),
        compiler_params=pltpu.CompilerParams(dimension_semantics=("parallel",)),
    )(xt, ut, mask, wlat, blat.reshape(1, Cm), wconv, bconv.reshape(1, Cout))
    out = out.reshape(Bb, H + 2, W + 2, Cout)[:, 1:H + 1, 1:W + 1, :]
    return jnp.transpose(out, (0, 3, 1, 2))


# ----------------------------------------------------------------------------
# Positional embedding (numpy, parameter-free)
# ----------------------------------------------------------------------------
def sine_pos_embed(Bb, H, W, num_pos_feats, temperature=10000.0):
    """PositionEmbeddingSine (normalize=True), all-valid mask. (B,H,W,2*npf)."""
    eps = 1e-6
    scale = 2.0 * math.pi
    y_embed = np.tile(np.arange(1, H + 1, dtype=np.float32)[:, None], (1, W))
    x_embed = np.tile(np.arange(1, W + 1, dtype=np.float32)[None, :], (H, 1))
    y_embed = y_embed / (y_embed[-1:, :] + eps) * scale
    x_embed = x_embed / (x_embed[:, -1:] + eps) * scale
    dim_t = np.arange(num_pos_feats, dtype=np.float32)
    dim_t = temperature ** (2.0 * np.floor(dim_t / 2.0) / num_pos_feats)
    pos_x = x_embed[:, :, None] / dim_t
    pos_y = y_embed[:, :, None] / dim_t
    pos_x = np.stack([np.sin(pos_x[:, :, 0::2]), np.cos(pos_x[:, :, 1::2])],
                     axis=3).reshape(H, W, -1)
    pos_y = np.stack([np.sin(pos_y[:, :, 0::2]), np.cos(pos_y[:, :, 1::2])],
                     axis=3).reshape(H, W, -1)
    pos = np.concatenate([pos_y, pos_x], axis=2).astype(np.float32)
    return jnp.broadcast_to(jnp.asarray(pos)[None], (Bb, H, W, 2 * num_pos_feats))


# ----------------------------------------------------------------------------
# Model blocks
# ----------------------------------------------------------------------------
def encoder_layer(src, pos, lp, cfg):
    d_inner, d_state, nheads, headdim, d_conv = cfg["mamba"]
    Bb, L, D = src.shape
    conv_dim = d_inner + 2 * d_state
    mp = lp["mamba"]

    # Mamba2 in_proj on (src + pos) — the add is fused into the matmul kernel.
    zxbcdt = matmul(src.reshape(Bb * L, D), mp["in_proj_w"],
                    x_add=pos.reshape(Bb * L, D)).reshape(Bb, L, -1)
    z = zxbcdt[..., :d_inner]
    xBC = zxbcdt[..., d_inner:d_inner + conv_dim]
    dt = zxbcdt[..., d_inner + conv_dim:]                   # (B, L, nheads) raw

    xBC = causal_conv1d_silu(xBC, mp["conv_w"], mp["conv_b"])
    xs = xBC[..., :d_inner]
    Bm = xBC[..., d_inner:d_inner + d_state]
    Cm = xBC[..., d_inner + d_state:]

    A = -jnp.exp(mp["A_log"])
    y = ssd(xs, dt, Bm, Cm, A, mp["D"], mp["dt_bias"], nheads, headdim)

    # fused: gated RMSNorm + out_proj + residual + LN1 + FFN + residual + LN2
    out = layer_tail(y.reshape(Bb * L, d_inner), z.reshape(Bb * L, d_inner),
                     src.reshape(Bb * L, D), lp)
    return out.reshape(Bb, L, D)


def model_forward(multiscales, params, cfg):
    d_model = cfg["d_model"]
    Bb = next(iter(multiscales.values())).shape[0]

    # image_projs + flatten encoded scales (coarsest level first), pos+level embed
    enc_names = cfg["encoded_scales"][::-1]
    src_tokens, pos_tokens, spatial_shapes = [], [], []
    for lvl, name in enumerate(enc_names):
        x = multiscales[name]                               # (B, C, H, W)
        _, Cin, H, W = x.shape
        tok = jnp.transpose(x, (0, 2, 3, 1)).reshape(Bb * H * W, Cin)
        tok = matmul(tok, params["proj"][name]["w"], params["proj"][name]["b"])
        src_tokens.append(tok.reshape(Bb, H * W, d_model))
        pe = sine_pos_embed(Bb, H, W, d_model // 2).reshape(Bb, H * W, d_model)
        pos_tokens.append(pe + params["level_embed"][lvl][None, None, :])
        spatial_shapes.append((H, W))
    src = jnp.concatenate(src_tokens, axis=1)               # (B, L, D)
    pos = jnp.concatenate(pos_tokens, axis=1)

    # transformer encoder (Mamba2 layers)
    for lp in params["layers"]:
        src = encoder_layer(src, pos, lp, cfg)

    # split memory back into per-level NCHW maps
    memory_features, idx = [], 0
    for (H, W) in spatial_shapes:
        m = src[:, idx:idx + H * W, :].reshape(Bb, H, W, d_model)
        memory_features.append(jnp.transpose(m, (0, 3, 1, 2)))
        idx += H * W

    # FPN for the finer, non-encoded scales
    fpn_keys = cfg["all_scales"][:cfg["num_fpn_levels"]][::-1]
    for i, name in enumerate(fpn_keys):
        x = multiscales[name]
        fp = params["fpn"][i]
        up = bilinear_upsample(memory_features[-1], x.shape[2], x.shape[3])
        y = fpn_merge(x, up, fp["lat_w"], fp["lat_b"], fp["out_w"], fp["out_b"])
        memory_features.append(y)

    assert len(memory_features) == len(cfg["all_scales"])
    return {k: f for k, f in zip(cfg["all_scales"], memory_features[::-1])}


# ----------------------------------------------------------------------------
# Deterministic parameter init
# ----------------------------------------------------------------------------
def init_params(key, cfg):
    d_model, d_ffn = cfg["d_model"], cfg["d_ffn"]
    d_inner, d_state, nheads, headdim, d_conv = cfg["mamba"]
    conv_dim = d_inner + 2 * d_state
    d_in_proj = 2 * d_inner + 2 * d_state + nheads

    keys = iter(jax.random.split(key, 512))

    def nrm(shape, scale=0.02):
        return scale * jax.random.normal(next(keys), shape, jnp.float32)

    params = {"proj": {}}
    for name in cfg["encoded_scales"]:
        cin = cfg["scale_dims"][name]
        params["proj"][name] = {"w": nrm((cin, d_model)),
                                "b": jnp.zeros((d_model,), jnp.float32)}
    params["level_embed"] = nrm((len(cfg["encoded_scales"]), d_model), 1.0)

    layers = []
    for _ in range(cfg["nlayers"]):
        A = jax.random.uniform(next(keys), (nheads,), jnp.float32, 1.0, 16.0)
        dt0 = jnp.exp(jax.random.uniform(next(keys), (nheads,), jnp.float32,
                                         float(np.log(1e-3)), float(np.log(1e-1))))
        dt_bias = dt0 + jnp.log(-jnp.expm1(-dt0))        # inverse softplus
        mamba = {
            "in_proj_w": nrm((d_model, d_in_proj)),
            "conv_w": nrm((d_conv, conv_dim), 0.2),
            "conv_b": jnp.zeros((conv_dim,), jnp.float32),
            "dt_bias": dt_bias,
            "A_log": jnp.log(A),
            "D": jnp.ones((nheads,), jnp.float32),
            "norm_w": jnp.ones((d_inner,), jnp.float32),
            "out_proj_w": nrm((d_inner, d_model)),
        }
        layers.append({
            "mamba": mamba,
            "norm1_w": jnp.ones((d_model,), jnp.float32),
            "norm1_b": jnp.zeros((d_model,), jnp.float32),
            "lin1_w": nrm((d_model, d_ffn)),
            "lin1_b": jnp.zeros((d_ffn,), jnp.float32),
            "lin2_w": nrm((d_ffn, d_model)),
            "lin2_b": jnp.zeros((d_model,), jnp.float32),
            "norm2_w": jnp.ones((d_model,), jnp.float32),
            "norm2_b": jnp.zeros((d_model,), jnp.float32),
        })
    params["layers"] = layers

    fpn = []
    for name in cfg["all_scales"][:cfg["num_fpn_levels"]][::-1]:
        cin = cfg["scale_dims"][name]
        fpn.append({
            "lat_w": nrm((cin, d_model)),
            "lat_b": jnp.zeros((d_model,), jnp.float32),
            "out_w": nrm((3, 3, d_model, d_model)),          # HWIO
            "out_b": jnp.zeros((d_model,), jnp.float32),
        })
    params["fpn"] = fpn
    return params


# ----------------------------------------------------------------------------
if __name__ == "__main__":
    cfg = {
        "d_model": 32,
        "d_ffn": 64,
        "nlayers": 2,
        "all_scales": ["res2", "res3", "res4", "res5"],       # sorted by stride
        "encoded_scales": ["res3", "res4", "res5"],
        "scale_dims": {"res2": 4, "res3": 8, "res4": 16, "res5": 32},
        "num_fpn_levels": 1,                                   # log2(8) - log2(4)
        # (d_inner, d_state, nheads, headdim, d_conv): expand=2 -> d_inner=64
        "mamba": (64, 16, 4, 16, 4),
    }

    key = jax.random.PRNGKey(0)
    kp, kx = jax.random.split(key)
    params = init_params(kp, cfg)

    in_shapes = {"res2": (2, 4, 16, 16), "res3": (2, 8, 8, 8),
                 "res4": (2, 16, 4, 4), "res5": (2, 32, 2, 2)}
    multiscales = {}
    for name, shp in in_shapes.items():
        kx, sub = jax.random.split(kx)
        multiscales[name] = jax.random.normal(sub, shp, jnp.float32)

    out = model_forward(multiscales, params, cfg)
    out = jax.tree_util.tree_map(jax.block_until_ready, out)

    assert out["res2"].shape == (2, 32, 16, 16)
    assert out["res3"].shape == (2, 32, 8, 8)
    assert out["res4"].shape == (2, 32, 4, 4)
    assert out["res5"].shape == (2, 32, 2, 2)
    for v in out.values():
        assert bool(jnp.all(jnp.isfinite(v)))
    print("KERNEL_OK")
</pallas_src>

<mosaic_0001>
module attributes {stable_mosaic.version = 11 : i64} {
  func.func @_matmul_kernel(%arg0: i32, %arg1: i32, %arg2: i32, %arg3: memref<8x32xbf16, #tpu.memory_space<vmem>>, %arg4: memref<32x128xbf16, #tpu.memory_space<vmem>>, %arg5: memref<1x128xf32, #tpu.memory_space<vmem>>, %arg6: memref<8x128xf32, #tpu.memory_space<vmem>>, %arg7: memref<8x128xf32, #tpu.memory_space<vmem>>) attributes {dimension_semantics = [#tpu.dimension_semantics<parallel>, #tpu.dimension_semantics<parallel>, #tpu.dimension_semantics<arbitrary>], iteration_bounds = array<i64: 1, 1, 1>, scalar_prefetch = 0 : i64, scratch_operands = 1 : i64, tpu.core_type = #tpu.core_type<tc>, window_params = [{transform_indices = @transform_0, window_bounds = array<i64: 8, 32>}, {transform_indices = @transform_1, window_bounds = array<i64: 32, 128>}, {transform_indices = @transform_2, window_bounds = array<i64: 1, 128>}, {transform_indices = @transform_3, window_bounds = array<i64: 8, 128>}]} {
    %c0 = arith.constant 0 : index
    %c0_0 = arith.constant 0 : index
    %0 = vector.load %arg3[%c0, %c0_0] : memref<8x32xbf16, #tpu.memory_space<vmem>>, vector<8x32xbf16>
    %c0_i32 = arith.constant 0 : i32
    %1 = arith.cmpi eq, %arg2, %c0_i32 : i32
    %2 = arith.extui %1 : i1 to i32
    %c0_i32_1 = arith.constant 0 : i32
    %3 = arith.cmpi ne, %2, %c0_i32_1 : i32
    scf.if %3 {
      %cst_10 = arith.constant 0.000000e+00 : f32
      %12 = vector.broadcast %cst_10 : f32 to vector<8x128xf32>
      %c0_11 = arith.constant 0 : index
      %c0_12 = arith.constant 0 : index
      %13 = vector.load %arg7[%c0_11, %c0_12] : memref<8x128xf32, #tpu.memory_space<vmem>>, vector<8x128xf32>
      tpu.vector_store %arg7[%c0_11, %c0_12], %12 {strides = array<i32>} : memref<8x128xf32, #tpu.memory_space<vmem>>, vector<8x128xf32>,
    } else {
    }
    %c0_2 = arith.constant 0 : index
    %c0_3 = arith.constant 0 : index
    %4 = vector.load %arg7[%c0_2, %c0_3] : memref<8x128xf32, #tpu.memory_space<vmem>>, vector<8x128xf32>
    %c0_4 = arith.constant 0 : index
    %c0_5 = arith.constant 0 : index
    %5 = vector.load %arg4[%c0_4, %c0_5] : memref<32x128xbf16, #tpu.memory_space<vmem>>, vector<32x128xbf16>
    %cst = arith.constant dense<0.000000e+00> : vector<8x128xf32>
    %6 = tpu.matmul %0, %5, %cst {dimension_numbers = #tpu.dot_dimension_numbers<[1], [0], [0], [1], [0, 0, 1, 1], [], []>} : vector<8x32xbf16>, vector<32x128xbf16>, vector<8x128xf32> -> vector<8x128xf32>
    %7 = arith.addf %4, %6 : vector<8x128xf32>
    %c0_6 = arith.constant 0 : index
    %c0_7 = arith.constant 0 : index
    %8 = vector.load %arg7[%c0_6, %c0_7] : memref<8x128xf32, #tpu.memory_space<vmem>>, vector<8x128xf32>
    tpu.vector_store %arg7[%c0_6, %c0_7], %7 {strides = array<i32>} : memref<8x128xf32, #tpu.memory_space<vmem>>, vector<8x128xf32>,
    %c0_i32_8 = arith.constant 0 : i32
    %9 = arith.cmpi eq, %arg2, %c0_i32_8 : i32
    %10 = arith.extui %9 : i1 to i32
    %c0_i32_9 = arith.constant 0 : i32
    %11 = arith.cmpi ne, %10, %c0_i32_9 : i32
    scf.if %11 {
      %c0_10 = arith.constant 0 : index
      %c0_11 = arith.constant 0 : index
      %12 = vector.load %arg7[%c0_10, %c0_11] : memref<8x128xf32, #tpu.memory_space<vmem>>, vector<8x128xf32>
      %c0_12 = arith.constant 0 : index
      %c0_13 = arith.constant 0 : index
      %13 = vector.load %arg5[%c0_12, %c0_13] : memref<1x128xf32, #tpu.memory_space<vmem>>, vector<1x128xf32>
      %14 = vector.broadcast %13 : vector<1x128xf32> to vector<8x128xf32>
      %15 = arith.addf %12, %14 : vector<8x128xf32>
      %c0_14 = arith.constant 0 : index
      %c0_15 = arith.constant 0 : index
      %16 = vector.load %arg6[%c0_14, %c0_15] : memref<8x128xf32, #tpu.memory_space<vmem>>, vector<8x128xf32>
      tpu.vector_store %arg6[%c0_14, %c0_15], %15 {strides = array<i32>} : memref<8x128xf32, #tpu.memory_space<vmem>>, vector<8x128xf32>,
    } else {
    }
    return
  }
  func.func @transform_0(%arg0: i32, %arg1: i32, %arg2: i32) -> (i32, i32) {
    %c0_i32 = arith.constant 0 : i32
    return %arg0, %arg2 : i32, i32
  }
  func.func @transform_1(%arg0: i32, %arg1: i32, %arg2: i32) -> (i32, i32) {
    %c0_i32 = arith.constant 0 : i32
    return %arg2, %arg1 : i32, i32
  }
  func.func @transform_2(%arg0: i32, %arg1: i32, %arg2: i32) -> (i32, i32) {
    %c0_i32 = arith.constant 0 : i32
    %c0_i32_0 = arith.constant 0 : i32
    return %c0_i32, %arg1 : i32, i32
  }
  func.func @transform_3(%arg0: i32, %arg1: i32, %arg2: i32) -> (i32, i32) {
    %c0_i32 = arith.constant 0 : i32
    return %arg0, %arg1 : i32, i32
  }
}

</mosaic_0001>

<bundles_post_ra>
// kernel: tpu_custom_call.1
= control target key start
LH: loop header
LB: loop body
LE: loop exit
PB: predicated region body
PF: predicated region fallthrough
CT: control target
= control target key end

     0   :  { %8 = vsyncpa [#allocation4], 0  ;;  %s309_s0 = inlined_call_operand.hbm [shape: bf16[8,32], index: 0, kind: input, shape index: {}]   ;;  %s310_s1 = inlined_call_operand.hbm [shape: bf16[32,128], index: 1, kind: input, shape index: {}]   ;;  %s311_s2 = inlined_call_operand.vmem [shape: f32[1,128], index: 2, kind: input, shape index: {}]   ;;  %s312_s3 = inlined_call_operand.hbm [shape: f32[8,128], index: 3, kind: output, shape index: {}]  }
   0x1   :  { %9 = vsyncpa [#allocation7], 0 }
   0x2   :  { %10 = vsyncpa [#allocation5], 0  ;;  %s236_s12 = smov [#allocation3]   ;;  %s237_s14 = smov [#allocation6]  }
   0x3   :  { %s17_s13 = sshll.u32 %s236_s12, 4  ;;  %s26_s15 = sshll.u32 %s237_s14, 4  ;;  %s18_s13 = int_to_ptr.vmem [resolvable:$true] %s17_s13  ;;  %s263_s15 = int_to_ptr.vmem [resolvable:$true] %s26_s15 }
   0x4   :  { %s164_s18 = scalar_lea.hbm %s309_s0, 64 }
   0x5   :  { %p165_p0 = scmp.ne.s32.totalorder %s309_s0, %s164_s18  ;;  %p168_p1 = scmp.lt.u32.totalorder %s164_s18, %s309_s0 }
   0x7   :  { %p170_p2 = pnand %p168_p1, %p165_p0 }
   0x9   :  { %173 = shalt.err (!%p170_p2)
}
   0xa   :  { %s174_s23 = scalar_lea.vmem %s18_s13, 64  ;;  %p179_p4 = scmp.lt.s32.totalorder %s18_s13, %s18_s13 }
   0xb   :  { %p175_p3 = scmp.ne.s32.totalorder %s18_s13, %s174_s23  ;;  %p180_p5 = scmp.lt.s32.totalorder %s174_s23, %s174_s23 }
   0xd   :  { %p181_p6 = por %p180_p5, %p179_p4 }
   0xf   :  { %p182_p7 = pnand %p181_p6, %p175_p3 }
  0x11   :  { %185 = shalt.err (!%p182_p7)
}
  0x12   :  { %20 = dma.hbm_to_vmem [thread:$0]  %s309_s0, 64, %s18_s13, [#allocation4]  }
  0x13   :  { %s186_s28 = scalar_lea.hbm %s310_s1, 256 }
  0x14   :  { %p187_p8 = scmp.ne.s32.totalorder %s310_s1, %s186_s28  ;;  %p190_p9 = scmp.lt.u32.totalorder %s186_s28, %s310_s1 }
  0x16   :  { %p192_p10 = pnand %p190_p9, %p187_p8 }
  0x18   :  { %195 = shalt.err (!%p192_p10)
}
  0x19   :  { %s196_s6 = scalar_lea.vmem %s263_s15, 256  ;;  %p201_p12 = scmp.lt.s32.totalorder %s263_s15, %s263_s15 }
  0x1a   :  { %p197_p11 = scmp.ne.s32.totalorder %s263_s15, %s196_s6  ;;  %p202_p13 = scmp.lt.s32.totalorder %s196_s6, %s196_s6 }
  0x1c   :  { %p203_p0 = por %p202_p13, %p201_p12 }
  0x1e   :  { %p204_p1 = pnand %p203_p0, %p197_p11 }
  0x20   :  { %207 = shalt.err (!%p204_p1)
}
  0x21   :  { %s238_s0 = smov 64   ;;  %s239_s7 = smov 4  }
  0x22   :  { %32 = dma.hbm_to_vmem [thread:$0]  %s310_s1, 256, %s263_s15, [#allocation7], %s238_s0, %s238_s0, %s239_s7  }
  0x23   :  { %230 = dma.done.wait [#allocation4], 64  }
  0x24   :  { %231 = vsyncadd [#allocation4], 4294967232 }
  0x25   :  { %232 = dma.done.wait [#allocation7], 256  }
  0x26   :  { %233 = vsyncadd [#allocation7], 4294967040  ;;  %v240_v0 = vmov 0.0   ;;  %vm241_vm0 = vmmov 0   ;;  %v162_v1 = vld [vmem:[#allocation6] sm:$0xff]   ;;  %v163_v2 = vld [vmem:[#allocation6 + $0x8] sm:$0xff]  }
  0x27   :  { %147 = vmatprep.subr.bf16.mxu0 %v240_v0  ;;  %151 = vmatprep.mubr.msk.bf16.mxu0 %vm241_vm0, %v240_v0  ;;  %v42_v3 = vld [vmem:[#allocation3] sm:$0xf]  ;;  %vm65_vm1 = vcmask 261120   ;;  %s242_s1 = smov [#allocation8]  }
  0x28   :  { %148 = vmatpush3.bf16.msra.mxu0 %v162_v1  ;;  %v143_v4 = vld [vmem:[%s311_s2] ss:$0 sm:$0xff]  ;;  %s130_s12 = sshll.u32 %s242_s1, 4  ;;  %s131_s12 = int_to_ptr.vmem [resolvable:$true] %s130_s12 }
  0x29   :  { %149 = vmatprep.subr.bf16.mxu0 %v240_v0  ;;  %s208_s13 = scalar_lea.vmem %s131_s12, 128  ;;  %p213_p3 = scmp.lt.s32.totalorder %s131_s12, %s131_s12 }
  0x2a   :  { %p209_p2 = scmp.ne.s32.totalorder %s131_s12, %s208_s13  ;;  %p214_p4 = scmp.lt.s32.totalorder %s208_s13, %s208_s13 }
  0x2c   :  { %150 = vmatpush3.bf16.msra.mxu0 %v163_v2  ;;  %p215_p5 = por %p214_p4, %p213_p3 }
  0x2e   :  { %p216_p6 = pnand %p215_p5, %p209_p2 }
  0x2f   :  { %152 = vmatmul.mubr.msk.bf16.vlgmr.msra.gmra.mrb[0].mxu0 %vm65_vm1, %v42_v3 }
 0x102   :  { %v103_v5 = vpop.f32.mrb[0].mxu0 }
 0x103   :  { %v122_v6 = vadd.f32 %v143_v4, %v103_v5  ;;  %v153_v7 = vpop.f32.mrb[1].mxu0 }
 0x104   :  { %v106_v8 = vpop.f32.mrb[2].mxu0 }
 0x105   :  { %123 = vst [vmem:[#allocation8] sm:$0xff] %v122_v6  ;;  %v154_v9 = vpop.f32.mrb[3].mxu0 }
 0x106   :  { %219 = shalt.err (!%p216_p6)
}
 0x107   :  { %s220_s2 = scalar_lea.hbm %s312_s3, 128 }
 0x108   :  { %p221_p7 = scmp.ne.s32.totalorder %s312_s3, %s220_s2  ;;  %p224_p8 = scmp.lt.u32.totalorder %s220_s2, %s312_s3 }
 0x10a   :  { %p226_p9 = pnand %p224_p8, %p221_p7 }
 0x10c   :  { %229 = shalt.err (!%p226_p9)
}
 0x10d   :  { %133 = dma.vmem_to_hbm [thread:$0]  %s131_s12, 128, %s312_s3, [#allocation5]  }
 0x10e   :  { %234 = dma.done.wait [#allocation5], 128  }
 0x10f   :  { %235 = vsyncadd [#allocation5], 4294967168 }
 0x110   :  { %137 = vsyncpa [#allocation4], 1 }
 0x111   :  { %138 = vsyncpa [#allocation7], 1 }
 0x112   :  { %139 = vsyncpa [#allocation5], 1 }

</bundles_post_ra>
